<compile_context>
chip_gen: v6e
topology: v6e:2x2x1
jax: 0.10.0
libtpu: 0.0.40
codegen_flags: <defaults>
</compile_context>

<pallas_src>
import functools

import jax
import jax.numpy as jnp
from jax import lax
from jax.experimental import pallas as pl
from jax.experimental.pallas import tpu as pltpu


# ----------------------------------------------------------------------------
# Kernels (channel-major blocks: (BB, C, T), reduction over the lane axis T)
# ----------------------------------------------------------------------------
def _revin_norm_kernel(x_ref, w_ref, b_ref, y_ref, mean_ref, std_ref, *,
                       eps, affine):
    x = x_ref[...].astype(jnp.float32)                      # (BB, C, T)
    mean = jnp.mean(x, axis=-1, keepdims=True)              # (BB, C, 1)
    d = x - mean
    var = jnp.mean(d * d, axis=-1, keepdims=True)           # biased variance
    std = jnp.sqrt(var + eps)                               # (BB, C, 1)
    inv_std = lax.rsqrt(var + eps)                          # EUP, per channel

    if affine:
        w = w_ref[...].astype(jnp.float32)                  # (1, C, 1)
        b = b_ref[...].astype(jnp.float32)                  # (1, C, 1)
        scale = inv_std * w                                 # (BB, C, 1)
        offset = b - mean * scale
    else:
        scale = inv_std
        offset = -mean * scale

    y_ref[...] = (x * scale + offset).astype(y_ref.dtype)   # fused mul+add
    mean_ref[...] = mean.astype(mean_ref.dtype)
    std_ref[...] = std.astype(std_ref.dtype)


def _revin_denorm_kernel(x_ref, mean_ref, std_ref, w_ref, b_ref, y_ref, *,
                         eps, affine):
    x = x_ref[...].astype(jnp.float32)                      # (BB, C, T)
    mean = mean_ref[...].astype(jnp.float32)                # (BB, C, 1)
    std = std_ref[...].astype(jnp.float32)                  # (BB, C, 1)

    if affine:
        w = w_ref[...].astype(jnp.float32)                  # (1, C, 1)
        b = b_ref[...].astype(jnp.float32)
        scale = std / (w + eps * eps)                       # per channel only
        offset = mean - b * scale
    else:
        scale = std
        offset = mean

    y_ref[...] = (x * scale + offset).astype(y_ref.dtype)   # fused mul+add


# ----------------------------------------------------------------------------
# Wrappers
# ----------------------------------------------------------------------------
def _pick_batch_block(B, per_batch_bytes, target_bytes=2 << 20, min_grid=2):
    """Largest divisor of B s.t. one x block stays ~<= target_bytes and (when
    possible) the grid keeps >= min_grid steps (v7x has 2 TensorCores)."""
    cap = max(1, min(B, target_bytes // max(per_batch_bytes, 1)))
    if B >= min_grid:
        cap = min(cap, max(1, B // min_grid))
    for bb in range(cap, 0, -1):
        if B % bb == 0:
            return bb
    return 1


def revin_norm(x, weight, bias, *, eps=1e-5, affine=True):
    """x: (B, T, C). Returns (y (B,T,C), mean (B,C,1) f32, stdev (B,C,1) f32)."""
    B, T, C = x.shape
    xt = jnp.transpose(x, (0, 2, 1))                        # (B, C, T) lane-dense
    w3 = weight.reshape(1, C, 1).astype(jnp.float32)
    b3 = bias.reshape(1, C, 1).astype(jnp.float32)

    bb = _pick_batch_block(B, T * C * x.dtype.itemsize)
    grid = (B // bb,)
    kernel = functools.partial(_revin_norm_kernel, eps=float(eps), affine=affine)

    yt, mean, std = pl.pallas_call(
        kernel,
        out_shape=(
            jax.ShapeDtypeStruct((B, C, T), x.dtype),
            jax.ShapeDtypeStruct((B, C, 1), jnp.float32),
            jax.ShapeDtypeStruct((B, C, 1), jnp.float32),
        ),
        grid_spec=pltpu.PrefetchScalarGridSpec(
            num_scalar_prefetch=0,
            grid=grid,
            in_specs=[
                pl.BlockSpec((bb, C, T), lambda i: (i, 0, 0)),
                pl.BlockSpec((1, C, 1), lambda i: (0, 0, 0)),
                pl.BlockSpec((1, C, 1), lambda i: (0, 0, 0)),
            ],
            out_specs=[
                pl.BlockSpec((bb, C, T), lambda i: (i, 0, 0)),
                pl.BlockSpec((bb, C, 1), lambda i: (i, 0, 0)),
                pl.BlockSpec((bb, C, 1), lambda i: (i, 0, 0)),
            ],
        ),
        compiler_params=pltpu.CompilerParams(
            dimension_semantics=("parallel",)),
    )(xt, w3, b3)
    return jnp.transpose(yt, (0, 2, 1)), mean, std


def revin_denorm(x, mean, stdev, weight, bias, *, eps=1e-5, affine=True):
    """x: (B, T, C); mean/stdev: (B, C, 1) from revin_norm. Returns (B, T, C)."""
    B, T, C = x.shape
    xt = jnp.transpose(x, (0, 2, 1))                        # (B, C, T)
    w3 = weight.reshape(1, C, 1).astype(jnp.float32)
    b3 = bias.reshape(1, C, 1).astype(jnp.float32)

    bb = _pick_batch_block(B, T * C * x.dtype.itemsize)
    grid = (B // bb,)
    kernel = functools.partial(_revin_denorm_kernel, eps=float(eps), affine=affine)

    yt = pl.pallas_call(
        kernel,
        out_shape=jax.ShapeDtypeStruct((B, C, T), x.dtype),
        grid_spec=pltpu.PrefetchScalarGridSpec(
            num_scalar_prefetch=0,
            grid=grid,
            in_specs=[
                pl.BlockSpec((bb, C, T), lambda i: (i, 0, 0)),
                pl.BlockSpec((bb, C, 1), lambda i: (i, 0, 0)),
                pl.BlockSpec((bb, C, 1), lambda i: (i, 0, 0)),
                pl.BlockSpec((1, C, 1), lambda i: (0, 0, 0)),
                pl.BlockSpec((1, C, 1), lambda i: (0, 0, 0)),
            ],
            out_specs=pl.BlockSpec((bb, C, T), lambda i: (i, 0, 0)),
        ),
        compiler_params=pltpu.CompilerParams(
            dimension_semantics=("parallel",)),
    )(xt, mean, stdev, w3, b3)
    return jnp.transpose(yt, (0, 2, 1))


class RevIN:
    """JAX/Pallas port of the PyTorch RevIN module (default config:
    affine=True, subtract_last=False, non_norm=False)."""

    def __init__(self, num_features, eps=1e-5, affine=True,
                 subtract_last=False, non_norm=False):
        # TODO(synk): subtract_last=True path not implemented (default config only).
        if subtract_last:
            raise NotImplementedError("subtract_last=True not supported")
        self.num_features = num_features
        self.eps = eps
        self.affine = affine
        self.non_norm = non_norm
        # deterministic init: ones / zeros, same as nn.Parameter init
        self.affine_weight = jnp.ones((num_features,), jnp.float32)
        self.affine_bias = jnp.zeros((num_features,), jnp.float32)
        self.mean = None    # (B, C, 1), channel-major
        self.stdev = None   # (B, C, 1), channel-major

    def __call__(self, x, mode: str):
        if mode == "norm":
            y, self.mean, self.stdev = revin_norm(
                x, self.affine_weight, self.affine_bias,
                eps=self.eps, affine=self.affine)
            return x if self.non_norm else y
        elif mode == "denorm":
            if self.non_norm:
                return x
            return revin_denorm(
                x, self.mean, self.stdev, self.affine_weight, self.affine_bias,
                eps=self.eps, affine=self.affine)
        else:
            raise NotImplementedError(mode)


# ----------------------------------------------------------------------------
# Main
# ----------------------------------------------------------------------------
if __name__ == "__main__":
    def _check(B, T, C, key):
        x = jax.random.normal(key, (B, T, C), jnp.float32) * 3.0 + 1.5
        layer = RevIN(num_features=C)

        # norm
        y = jax.block_until_ready(layer(x, "norm"))

        # pure-JAX reference
        mean_ref = jnp.mean(x, axis=1, keepdims=True)
        std_ref = jnp.sqrt(jnp.var(x, axis=1, keepdims=True) + layer.eps)
        y_ref = (x - mean_ref) / std_ref * layer.affine_weight + layer.affine_bias
        assert jnp.allclose(y, y_ref, atol=1e-4, rtol=1e-4), "norm mismatch"

        # denorm (round-trip recovers x)
        x_back = jax.block_until_ready(layer(y, "denorm"))
        assert jnp.allclose(x_back, x, atol=1e-3, rtol=1e-3), "denorm mismatch"

    key = jax.random.PRNGKey(0)
    k1, k2 = jax.random.split(key)
    _check(2, 8, 4, k1)     # module-consistent small shape (BB=1, grid=2)
    _check(4, 16, 4, k2)    # exercises batch folding (BB=2, grid=2)
    print("KERNEL_OK")
</pallas_src>

<mosaic_0001>
module attributes {stable_mosaic.version = 11 : i64} {
  func.func @_revin_norm_kernel(%arg0: i32, %arg1: memref<1x4x8xf32, #tpu.memory_space<vmem>>, %arg2: memref<1x4x1xf32, #tpu.memory_space<vmem>>, %arg3: memref<1x4x1xf32, #tpu.memory_space<vmem>>, %arg4: memref<1x4x8xf32, #tpu.memory_space<vmem>>, %arg5: memref<1x4x1xf32, #tpu.memory_space<vmem>>, %arg6: memref<1x4x1xf32, #tpu.memory_space<vmem>>) attributes {dimension_semantics = [#tpu.dimension_semantics<parallel>], iteration_bounds = array<i64: 2>, scalar_prefetch = 0 : i64, scratch_operands = 0 : i64, tpu.core_type = #tpu.core_type<tc>, window_params = [{transform_indices = @transform_0, window_bounds = array<i64: 1, 4, 8>}, {pipeline_mode = #tpu.pipeline_mode<synchronous>, transform_indices = @transform_1, window_bounds = array<i64: 1, 4, 1>}, {pipeline_mode = #tpu.pipeline_mode<synchronous>, transform_indices = @transform_2, window_bounds = array<i64: 1, 4, 1>}, {transform_indices = @transform_3, window_bounds = array<i64: 1, 4, 8>}, {transform_indices = @transform_4, window_bounds = array<i64: 1, 4, 1>}, {transform_indices = @transform_5, window_bounds = array<i64: 1, 4, 1>}]} {
    %c0 = arith.constant 0 : index
    %c0_0 = arith.constant 0 : index
    %c0_1 = arith.constant 0 : index
    %0 = vector.load %arg1[%c0, %c0_0, %c0_1] : memref<1x4x8xf32, #tpu.memory_space<vmem>>, vector<1x4x8xf32>
    %cst = arith.constant dense<0.000000e+00> : vector<1x4xf32>
    %1 = vector.multi_reduction <add>, %0, %cst [2] : vector<1x4x8xf32> to vector<1x4xf32>
    %2 = vector.shape_cast %1 : vector<1x4xf32> to vector<1x4x1xf32>
    %cst_2 = arith.constant 8.000000e+00 : f32
    %3 = vector.broadcast %cst_2 : f32 to vector<1x4x1xf32>
    %4 = arith.divf %2, %3 : vector<1x4x1xf32>
    %5 = vector.broadcast %4 : vector<1x4x1xf32> to vector<1x4x8xf32>
    %6 = arith.subf %0, %5 : vector<1x4x8xf32>
    %7 = arith.mulf %6, %6 : vector<1x4x8xf32>
    %cst_3 = arith.constant dense<0.000000e+00> : vector<1x4xf32>
    %8 = vector.multi_reduction <add>, %7, %cst_3 [2] : vector<1x4x8xf32> to vector<1x4xf32>
    %9 = vector.shape_cast %8 : vector<1x4xf32> to vector<1x4x1xf32>
    %cst_4 = arith.constant 8.000000e+00 : f32
    %10 = vector.broadcast %cst_4 : f32 to vector<1x4x1xf32>
    %11 = arith.divf %9, %10 : vector<1x4x1xf32>
    %cst_5 = arith.constant 9.99999974E-6 : f32
    %12 = vector.broadcast %cst_5 : f32 to vector<1x4x1xf32>
    %13 = arith.addf %11, %12 : vector<1x4x1xf32>
    %14 = math.sqrt %13 : vector<1x4x1xf32>
    %cst_6 = arith.constant 9.99999974E-6 : f32
    %15 = vector.broadcast %cst_6 : f32 to vector<1x4x1xf32>
    %16 = arith.addf %11, %15 : vector<1x4x1xf32>
    %17 = math.rsqrt %16 : vector<1x4x1xf32>
    %c0_7 = arith.constant 0 : index
    %c0_8 = arith.constant 0 : index
    %c0_9 = arith.constant 0 : index
    %18 = vector.load %arg2[%c0_7, %c0_8, %c0_9] : memref<1x4x1xf32, #tpu.memory_space<vmem>>, vector<1x4x1xf32>
    %c0_10 = arith.constant 0 : index
    %c0_11 = arith.constant 0 : index
    %c0_12 = arith.constant 0 : index
    %19 = vector.load %arg3[%c0_10, %c0_11, %c0_12] : memref<1x4x1xf32, #tpu.memory_space<vmem>>, vector<1x4x1xf32>
    %20 = arith.mulf %17, %18 : vector<1x4x1xf32>
    %21 = arith.mulf %4, %20 : vector<1x4x1xf32>
    %22 = arith.subf %19, %21 : vector<1x4x1xf32>
    %23 = vector.broadcast %20 : vector<1x4x1xf32> to vector<1x4x8xf32>
    %24 = arith.mulf %0, %23 : vector<1x4x8xf32>
    %25 = vector.broadcast %22 : vector<1x4x1xf32> to vector<1x4x8xf32>
    %26 = arith.addf %24, %25 : vector<1x4x8xf32>
    %c0_13 = arith.constant 0 : index
    %c0_14 = arith.constant 0 : index
    %c0_15 = arith.constant 0 : index
    %27 = vector.load %arg4[%c0_13, %c0_14, %c0_15] : memref<1x4x8xf32, #tpu.memory_space<vmem>>, vector<1x4x8xf32>
    tpu.vector_store %arg4[%c0_13, %c0_14, %c0_15], %26 {strides = array<i32>} : memref<1x4x8xf32, #tpu.memory_space<vmem>>, vector<1x4x8xf32>,
    %c0_16 = arith.constant 0 : index
    %c0_17 = arith.constant 0 : index
    %c0_18 = arith.constant 0 : index
    %28 = vector.load %arg5[%c0_16, %c0_17, %c0_18] : memref<1x4x1xf32, #tpu.memory_space<vmem>>, vector<1x4x1xf32>
    tpu.vector_store %arg5[%c0_16, %c0_17, %c0_18], %4 {strides = array<i32>} : memref<1x4x1xf32, #tpu.memory_space<vmem>>, vector<1x4x1xf32>,
    %c0_19 = arith.constant 0 : index
    %c0_20 = arith.constant 0 : index
    %c0_21 = arith.constant 0 : index
    %29 = vector.load %arg6[%c0_19, %c0_20, %c0_21] : memref<1x4x1xf32, #tpu.memory_space<vmem>>, vector<1x4x1xf32>
    tpu.vector_store %arg6[%c0_19, %c0_20, %c0_21], %14 {strides = array<i32>} : memref<1x4x1xf32, #tpu.memory_space<vmem>>, vector<1x4x1xf32>,
    return
  }
  func.func @transform_0(%arg0: i32) -> (i32, i32, i32) {
    %c0_i32 = arith.constant 0 : i32
    %c0_i32_0 = arith.constant 0 : i32
    %c0_i32_1 = arith.constant 0 : i32
    return %arg0, %c0_i32, %c0_i32_0 : i32, i32, i32
  }
  func.func @transform_1(%arg0: i32) -> (i32, i32, i32) {
    %c0_i32 = arith.constant 0 : i32
    %c0_i32_0 = arith.constant 0 : i32
    %c0_i32_1 = arith.constant 0 : i32
    %c0_i32_2 = arith.constant 0 : i32
    return %c0_i32, %c0_i32_0, %c0_i32_1 : i32, i32, i32
  }
  func.func @transform_2(%arg0: i32) -> (i32, i32, i32) {
    %c0_i32 = arith.constant 0 : i32
    %c0_i32_0 = arith.constant 0 : i32
    %c0_i32_1 = arith.constant 0 : i32
    %c0_i32_2 = arith.constant 0 : i32
    return %c0_i32, %c0_i32_0, %c0_i32_1 : i32, i32, i32
  }
  func.func @transform_3(%arg0: i32) -> (i32, i32, i32) {
    %c0_i32 = arith.constant 0 : i32
    %c0_i32_0 = arith.constant 0 : i32
    %c0_i32_1 = arith.constant 0 : i32
    return %arg0, %c0_i32, %c0_i32_0 : i32, i32, i32
  }
  func.func @transform_4(%arg0: i32) -> (i32, i32, i32) {
    %c0_i32 = arith.constant 0 : i32
    %c0_i32_0 = arith.constant 0 : i32
    %c0_i32_1 = arith.constant 0 : i32
    return %arg0, %c0_i32, %c0_i32_0 : i32, i32, i32
  }
  func.func @transform_5(%arg0: i32) -> (i32, i32, i32) {
    %c0_i32 = arith.constant 0 : i32
    %c0_i32_0 = arith.constant 0 : i32
    %c0_i32_1 = arith.constant 0 : i32
    return %arg0, %c0_i32, %c0_i32_0 : i32, i32, i32
  }
}

</mosaic_0001>

<bundles_post_ra>
// kernel: tpu_custom_call.1
= control target key start
LH: loop header
LB: loop body
LE: loop exit
PB: predicated region body
PF: predicated region fallthrough
CT: control target
= control target key end

     0   :  { %11 = vsyncpa [#allocation3], 0  ;;  %s678_s0 = inlined_call_operand.vmem [shape: f32[2,4,8], index: 0, kind: input, shape index: {}]   ;;  %s679_s1 = inlined_call_operand.vmem [shape: f32[1,4,1], index: 1, kind: input, shape index: {}]   ;;  %s680_s2 = inlined_call_operand.vmem [shape: f32[1,4,1], index: 2, kind: input, shape index: {}]   ;;  %s681_s3 = inlined_call_operand.hbm [shape: f32[2,4,8], index: 3, kind: output, shape index: {0}]   ;;  %s682_s4 = inlined_call_operand.vmem [shape: f32[2,4,1], index: 4, kind: output, shape index: {1}]   ;;  %s683_s5 = inlined_call_operand.vmem [shape: f32[2,4,1], index: 5, kind: output, shape index: {2}]  }
   0x1   :  { %13 = vsyncpa [#allocation3 + $0x1], 0  ;;  %s569_s18 = smov 0   ;;  %s571_s19 = smov 0  }
   0x2   :  { %s573_s20 = smov 0   ;;  %s575_s21 = smov 0  }
   0x3 LB: > { %s590_s22 = sadd.s32 4294967295, %s535_s21   ;;  %s419_s23 = sadd.s32 4294967294, %s535_s21   ;;  %s535_s21 = sphi %s575_s21, %s689_s21   ;;  %s531_s20 = sphi %s573_s20, %s688_s20   ;;  %s527_s19 = sphi %s571_s19, %s687_s19   ;;  %s523_s18 = sphi %s569_s18, %s686_s18  }
   0x4   : > { %s594_s24 = sadd.s32 1, %s535_s21   ;;  %s94_s25 = sadd.s32 1, %s531_s20 }
   0x5   : > { %s91_s26 = ssub.s32 %s535_s21, %s594_s24  ;;  %p104_p0 = scmp.ne.s32.totalorder %s531_s20, %s527_s19 }
   0x6   : > { %p92_p1 = scmp.eq.s32.totalorder %s91_s26, 0  ;;  %p105_p2 = scmp.eq.s32.totalorder %s590_s22, 1 }
   0x7   : > { %p110_p3 = scmp.ne.s32.totalorder %s527_s19, %s523_s18  ;;  %p111_p4 = scmp.eq.s32.totalorder %s419_s23, 1 }
   0x8   : > { %s605_s27 = scalar_select %p92_p1, %s531_s20, %s94_s25  }
   0x9   : > { %p607_p5 = por %p105_p2, %p104_p0  ;;  %p611_p6 = por %p111_p4, %p110_p3 }
   0xa   : > { %p422_p7 = scmp.ge.s32.totalorder %s535_s21, 1  ;;  %p194_p8 = scmp.lt.s32.totalorder %s535_s21, 3 }
   0xc   : > { %p195_p9 = pnand %p422_p7, %p194_p8 }
   0xd   : > { %p229_p10 = scmp.lt.s32.totalorder (!%p195_p9), %s590_s22, 1  ;;  %s214_s26 = sand.u32 (!%p195_p9), 1, %s527_s19  }
   0xe   : > { %198 = sbr.rel (%p195_p9) target bundleno = 471 (0x1d7), region = 32  ;;  %s538_s14 = smov (!%p195_p9), [#allocation2]  }
  0x13   : > { %s230_s30 = scalar_select %p229_p10, %s590_s22, 1  ;;  %vm242_vm0 = vcmask 60416   ;;  %vm281_vm1 = vcmask 3072   ;;  %v537_v7 = vmov 0   ;;  %v263_v11 = vld [vmem:[%s679_s1] sm:$0xf] }
  0x14   : > { %471 = vset.pattern.permute.xlu1 %v537_v7  ;;  %472 = vset.pattern.permute.xlu0 %v537_v7  ;;  %v264_v16 = vld [vmem:[%s680_s2] sm:$0xf] }
  0x15   : > { %s619_s6 = sshll.u32 %s230_s30, 2  ;;  %s423_s30 = sshll.u32 %s214_s26, 2 }
  0x16   : > { %s232_s9 = scalar_lea.vmem %s678_s0, %s619_s6  ;;  %s236_s12 = scalar_lea.vmem %s682_s4, %s619_s6 }
  0x17   : > { %v241_v0 = vld [vmem:[%s232_s9] sm:$0xf]  ;;  %s240_s17 = scalar_lea.vmem %s683_s5, %s619_s6  ;;  %s428_s6 = sshll.u32 %s590_s22, 6 }
  0x18   : > { %v243_v1 = vsel %vm242_vm0, %v241_v0, 0.0  ;;  %s216_s7 = scalar_lea.vmem [#allocation2], %s423_s30  ;;  %s304_s11 = scalar_lea.hbm %s681_s3, %s428_s6 }
  0x19   : > { %244 = vadd.xlane.f32.xlu0 %v243_v1  ;;  %s306_s8 = sshll.u32 %s216_s7, 4  ;;  %s479_s22 = sshll.u32 %s538_s14, 4  ;;  %s307_s8 = int_to_ptr.vmem [resolvable:$true] %s306_s8  ;;  %s480_s22 = int_to_ptr.vmem [resolvable:$false] %s479_s22 }
  0x1a   : > { %s475_s13 = scalar_lea.vmem %s307_s8, 64  ;;  %s481_s15 = scalar_lea.vmem %s480_s22, 128 }
  0x1b   : > { %p476_p11 = scmp.ne.s32.totalorder %s307_s8, %s475_s13  ;;  %p482_p0 = scmp.lt.s32.totalorder %s307_s8, %s480_s22 }
  0x1c   : > { %p483_p1 = scmp.lt.s32.totalorder %s481_s15, %s475_s13 }
  0x1d   : > { %p477_p12 = pnand %p476_p11, %p607_p5 }
  0x1e   : > { %p484_p2 = por %p483_p1, %p482_p0 }
  0x1f   : > { %p478_p13 = pneg %p477_p12 }
  0x21   : > { %p485_p3 = pnand %p484_p2, %p478_p13 }
  0xa2   : > { %v245_v2 = vpop.xlane.xlu0 %244 }
  0xa3   : > { %v247_v3 = vmul.f32 0.125, %v245_v2 }
  0xa5   : > { %282 = vst.msk [vmem:[%s236_s12] sm:$0xf] %vm281_vm1, %v247_v3  ;;  %v248_v4 = vsub.f32 %v241_v0, %v247_v3  ;;  %s285_s12 = scalar_lea.sflag [#allocation3], %s214_s26 }
  0xa7   : > { %v249_v5 = vmul.f32 %v248_v4, %v248_v4 }
  0xa9   : > { %v250_v6 = vsel %vm242_vm0, %v249_v5, 0.0 }
  0xaa   : > { %251 = vadd.xlane.f32.xlu0 %v250_v6 }
 0x133   : > { %v252_v8 = vpop.xlane.xlu0 %251 }
 0x134   : > { %v253_v9 = vmul.f32 0.125, %v252_v8 }
 0x136   : > { %v254_v10 = vadd.f32 1e-05, %v253_v9 }
 0x138   : > { %473 = vrsqrt.f32 %v254_v10  ;;  %vm257_vm2 = vcmp.eq.f32.partialorder %v254_v10, inf  ;;  %v260_v15 = vand.u32 2147483648, %v254_v10  ;;  %vm259_vm3 = vcmp.eq.f32.partialorder %v254_v10, 0.0 }
 0x145   : > { %v474_v12 = vpop.eup %473 }
 0x146   : > { %v265_v13 = vmul.f32 %v474_v12, %v263_v11  ;;  %v256_v14 = vmul.f32 %v474_v12, %v254_v10 }
 0x148   : > { %270 = vperm.xlu1 %471, %v265_v13   ;;  %v258_v17 = vsel %vm257_vm2, %v254_v10, %v256_v14  ;;  %v266_v18 = vmul.f32 %v265_v13, %v247_v3 }
 0x149   : > { %v261_v19 = vsel %vm259_vm3, %v260_v15, %v258_v17 }
 0x14a   : > { %283 = vst.msk [vmem:[%s240_s17] sm:$0xf] %vm281_vm1, %v261_v19  ;;  %v267_v20 = vsub.f32 %v264_v16, %v266_v18 }
 0x14c   : > { %276 = vperm.xlu1 %471, %v267_v20  }
 0x1c3   : > { %v271_v21 = vpop.permute.xlu1 %270 }
 0x1c4   : > { %v273_v22 = vmul.f32 %v271_v21, %v241_v0 }
 0x1c7   : > { %v277_v23 = vpop.permute.xlu1 %276 }
 0x1c8   : > { %v279_v24 = vadd.f32 %v277_v23, %v273_v22 }
 0x1ca   : > { %280 = vst.msk [vmem:[%s216_s7] sm:$0xf] %vm242_vm0, %v279_v24 }
 0x1cb   : > { %488 = shalt.err (!%p485_p3)
}
 0x1cc   : > { %s489_s16 = scalar_lea.hbm %s304_s11, 64  ;;  %s493_s25 = scalar_lea.hbm %s681_s3, 128 }
 0x1cd   : > { %p490_p4 = scmp.ne.s32.totalorder %s304_s11, %s489_s16  ;;  %p494_p9 = scmp.lt.s32.totalorder %s304_s11, %s681_s3 }
 0x1ce   : > { %p495_p10 = scmp.lt.s32.totalorder %s493_s25, %s489_s16 }
 0x1cf   : > { %p491_p7 = pnand %p490_p4, %p607_p5 }
 0x1d0   : > { %p496_p11 = por %p495_p10, %p494_p9 }
 0x1d1   : > { %p492_p8 = pneg %p491_p7 }
 0x1d3   : > { %p497_p12 = pnand %p496_p11, %p492_p8 }
 0x1d5   : > { %500 = shalt.err (!%p497_p12)
}
 0x1d6   : > { %431 = dma.vmem_to_hbm [thread:$0]  (%p607_p5), %s307_s8, 64, %s304_s11, %s285_s12  }
 0x1d7 PF: > { %p437_p13 = scmp.ge.s32.totalorder %s535_s21, 2  ;;  %s324_s6 = sand.u32 1, %s523_s18  }
 0x1d8   : > { %s325_s7 = scalar_lea.sflag [#allocation3], %s324_s6 }
 0x1d9   : > { %p434_p0 = pnand %p437_p13, %p611_p6 }
 0x1db   : > { %p435_p1 = pneg %p434_p0 }
 0x1dd   : > { %518 = dma.done.wait (%p435_p1), %s325_s7, 64  }
 0x1de   : > { %520 = vsyncadd (%p435_p1), %s325_s7, 4294967232  ;;  %p16_p2 = scmp.ge.s32.totalorder %s594_s24, 4   ;;  %s686_s18 = smov %s527_s19 }
 0x1df   : > { %s687_s19 = smov %s531_s20  ;;  %s688_s20 = smov %s605_s27 }
 0x1e0   : > { %s689_s21 = smov %s594_s24  ;;  %18 = sbr.rel (!%p16_p2) target bundleno = 3 (0x3), region = 91 }
 0x1e5   :  { %344 = vsyncpa [#allocation3], 1 }
 0x1e6   :  { %346 = vsyncpa [#allocation3 + $0x1], 1 }

</bundles_post_ra>
